<compile_context>
chip_gen: v7x
topology: tpu7x:2x2x1
jax: 0.10.0
libtpu: 0.0.40
codegen_flags: <defaults>
</compile_context>

<pallas_src>
import jax
import jax.numpy as jnp
from jax.experimental import pallas as pl
from jax.experimental.pallas import tpu as pltpu

D_IN, H1, H2, H3, D_OUT = 28 * 28, 256, 128, 64, 1


def _round_up(a, m):
    return ((a + m - 1) // m) * m


def _pick_bm(B):
    """Batch tile: single tile for small B; else >=8 grid steps, <=1024 rows."""
    if B <= 256:
        return B                      # block dims equal the full array dims
    # >= 8 grid steps (2 v7x TCs x >= 4 pipelined steps each), 256-aligned so
    # the (1, bm) output block stays a multiple of 128 lanes, capped at 1024
    # rows so the double-buffered f32 x tile fits every chip's VMEM budget.
    return min(1024, max(256, _round_up(-(-B // 8), 256)))


def _disc_kernel(x_ref, w1_ref, b1_ref, w2_ref, b2_ref,
                 w3_ref, b3_ref, w4_ref, b4_ref, o_ref):
    # x arrives as f32 straight from HBM (single pass); cast to bf16 in VMEM
    # so every matmul runs with bf16 operands / f32 accumulation on the MXU.
    x = x_ref[...].astype(jnp.bfloat16)
    # Layer 1: Linear(784, 256) + ReLU
    h = jnp.dot(x, w1_ref[...], preferred_element_type=jnp.float32)
    h = jnp.maximum(h + b1_ref[...], 0.0).astype(jnp.bfloat16)
    # Layer 2: Linear(256, 128) + ReLU
    h = jnp.dot(h, w2_ref[...], preferred_element_type=jnp.float32)
    h = jnp.maximum(h + b2_ref[...], 0.0).astype(jnp.bfloat16)
    # Layer 3: Linear(128, 64) + ReLU
    h = jnp.dot(h, w3_ref[...], preferred_element_type=jnp.float32)
    h = jnp.maximum(h + b3_ref[...], 0.0).astype(jnp.bfloat16)
    # Output: Linear(64, 1) + Sigmoid, computed transposed so the result is a
    # lane-dense (1, bm) row (unmasked vst on full tiles) instead of a 1-lane
    # (bm, 1) column.  logits_t = w4 (1,64) . h^T (64,bm) -> (1, bm).
    logits_t = jax.lax.dot_general(
        w4_ref[...], h, (((1,), (1,)), ((), ())),
        preferred_element_type=jnp.float32)
    o_ref[...] = jax.nn.sigmoid(logits_t + b4_ref[...]).astype(o_ref.dtype)


def discriminator_forward(x, params, *, bm=None):
    """x: (B, 784) float32 (or bf16).  params: w1..w3 (in,out), w4 (1,64)
    = (out,in), b1..b3 (1,out), b4 (1,1).

    Returns (B, 1) float32 sigmoid probabilities, matching the PyTorch
    Discriminator.forward semantics (bf16 matmul operands, f32 accumulate).
    If overriding bm for B > bm, keep it a multiple of 256.
    """
    B = x.shape[0]
    if bm is None:
        bm = _pick_bm(B)
    grid = (pl.cdiv(B, bm),)

    # Weights as bf16 (MXU-native on all generations, <0.5 MiB total);
    # biases stay f32 for the epilogue adds.
    w1 = params["w1"].astype(jnp.bfloat16)
    w2 = params["w2"].astype(jnp.bfloat16)
    w3 = params["w3"].astype(jnp.bfloat16)
    w4 = params["w4"].astype(jnp.bfloat16)          # (1, 64) == (out, in)
    b1, b2, b3, b4 = params["b1"], params["b2"], params["b3"], params["b4"]

    # Weights/biases are tiny: hand the full array to every grid step.
    def full_spec(shape):
        return pl.BlockSpec(shape, lambda i: (0, 0))

    # Scheduler hint: lets XLA overlap the surrounding slice/reshape with the
    # kernel.
    macs = D_IN * H1 + H1 * H2 + H2 * H3 + H3 * D_OUT
    cost = pl.CostEstimate(
        flops=2 * B * macs,
        transcendentals=B,                              # sigmoid exp per row
        bytes_accessed=(B * D_IN * x.dtype.itemsize     # x read, single pass
                        + B * 4                         # output
                        + 2 * macs                      # bf16 weights
                        + 4 * (H1 + H2 + H3 + D_OUT)))  # f32 biases

    out_2d = pl.pallas_call(
        _disc_kernel,
        out_shape=jax.ShapeDtypeStruct((1, B), jnp.float32),
        grid_spec=pltpu.PrefetchScalarGridSpec(
            num_scalar_prefetch=0,
            grid=grid,
            in_specs=[
                pl.BlockSpec((bm, D_IN), lambda i: (i, 0)),   # x, batch-tiled
                full_spec((D_IN, H1)), full_spec((1, H1)),
                full_spec((H1, H2)),   full_spec((1, H2)),
                full_spec((H2, H3)),   full_spec((1, H3)),
                full_spec((D_OUT, H3)), full_spec((1, D_OUT)),
            ],
            # Lane-dense output: each step writes a (1, bm) block of (1, B);
            # the ragged last block is masked by Pallas.
            out_specs=pl.BlockSpec((1, bm), lambda i: (0, i)),
        ),
        compiler_params=pltpu.CompilerParams(
            dimension_semantics=("parallel",),
            vmem_limit_bytes=40 * 1024 * 1024),
        cost_estimate=cost,
    )(x, w1, b1, w2, b2, w3, b3, w4, b4)

    # (1, B) -> (B, 1)
    return out_2d[0][:, None]


def init_params(key):
    """Deterministic init mimicking PyTorch Linear default (uniform +-1/sqrt(fan_in))."""
    params = {}
    dims = [(D_IN, H1), (H1, H2), (H2, H3)]
    for idx, (fan_in, fan_out) in enumerate(dims, start=1):
        key, kw, kb = jax.random.split(key, 3)
        bound = 1.0 / jnp.sqrt(fan_in)
        params[f"w{idx}"] = jax.random.uniform(
            kw, (fan_in, fan_out), jnp.float32, minval=-bound, maxval=bound)
        params[f"b{idx}"] = jax.random.uniform(
            kb, (1, fan_out), jnp.float32, minval=-bound, maxval=bound)
    # Final layer stored in (out=1, in=64) layout for the transposed dot.
    key, kw, kb = jax.random.split(key, 3)
    bound = 1.0 / jnp.sqrt(H3)
    params["w4"] = jax.random.uniform(
        kw, (D_OUT, H3), jnp.float32, minval=-bound, maxval=bound)
    params["b4"] = jax.random.uniform(
        kb, (1, D_OUT), jnp.float32, minval=-bound, maxval=bound)
    return params


def reference_forward(x, p):
    """Pure-JAX reference using the same bf16-operand / f32-accumulate recipe."""
    def lin(h, w, b):
        return jnp.dot(h, w.astype(jnp.bfloat16),
                       preferred_element_type=jnp.float32) + b
    h = x.astype(jnp.bfloat16)
    h = jnp.maximum(lin(h, p["w1"], p["b1"]), 0.0).astype(jnp.bfloat16)
    h = jnp.maximum(lin(h, p["w2"], p["b2"]), 0.0).astype(jnp.bfloat16)
    h = jnp.maximum(lin(h, p["w3"], p["b3"]), 0.0).astype(jnp.bfloat16)
    logits = jnp.dot(h, p["w4"].astype(jnp.bfloat16).T,
                     preferred_element_type=jnp.float32) + p["b4"]
    return jax.nn.sigmoid(logits)


if __name__ == "__main__":
    key = jax.random.PRNGKey(0)
    key, kx = jax.random.split(key)
    params = init_params(key)

    # 1) Tiny batch: B=8 -> single tile (block dims equal full array dims).
    x_small = jax.random.normal(kx, (8, D_IN), jnp.float32)
    out = jax.block_until_ready(discriminator_forward(x_small, params))
    ref = reference_forward(x_small, params)
    assert out.shape == (8, D_OUT)
    assert jnp.allclose(out, ref, atol=2e-3, rtol=2e-3), "mismatch vs reference (B=8)"

    # 2) Ragged multi-tile path: B=300 -> bm=256, grid=2, masked last block
    #    (no wrapper-side padding or casting of x).
    key, kx2 = jax.random.split(key)
    x_big = jax.random.normal(kx2, (300, D_IN), jnp.float32)
    out_big = jax.block_until_ready(discriminator_forward(x_big, params))
    ref_big = reference_forward(x_big, params)
    assert out_big.shape == (300, D_OUT)
    assert jnp.allclose(out_big, ref_big, atol=2e-3, rtol=2e-3), "mismatch vs reference (B=300)"

    # 3) Same batch with a smaller explicit tile: 3 grid steps, ragged edge.
    out_128 = jax.block_until_ready(discriminator_forward(x_big, params, bm=128))
    assert out_128.shape == (300, D_OUT)
    assert jnp.allclose(out_128, ref_big, atol=2e-3, rtol=2e-3), "mismatch vs reference (bm=128)"

    print("KERNEL_OK")
</pallas_src>

<mosaic_0001>
module attributes {stable_mosaic.version = 11 : i64} {
  func.func @_disc_kernel(%arg0: i32, %arg1: memref<8x784xf32, #tpu.memory_space<vmem>>, %arg2: memref<784x256xbf16, #tpu.memory_space<vmem>>, %arg3: memref<1x256xf32, #tpu.memory_space<vmem>>, %arg4: memref<256x128xbf16, #tpu.memory_space<vmem>>, %arg5: memref<1x128xf32, #tpu.memory_space<vmem>>, %arg6: memref<128x64xbf16, #tpu.memory_space<vmem>>, %arg7: memref<1x64xf32, #tpu.memory_space<vmem>>, %arg8: memref<1x64xbf16, #tpu.memory_space<vmem>>, %arg9: memref<1x1xf32, #tpu.memory_space<vmem>>, %arg10: memref<1x8xf32, #tpu.memory_space<vmem>>) attributes {dimension_semantics = [#tpu.dimension_semantics<parallel>], iteration_bounds = array<i64: 1>, scalar_prefetch = 0 : i64, scratch_operands = 0 : i64, tpu.core_type = #tpu.core_type<tc>, window_params = [{transform_indices = @transform_0, window_bounds = array<i64: 8, 784>}, {pipeline_mode = #tpu.pipeline_mode<synchronous>, transform_indices = @transform_1, window_bounds = array<i64: 784, 256>}, {pipeline_mode = #tpu.pipeline_mode<synchronous>, transform_indices = @transform_2, window_bounds = array<i64: 1, 256>}, {pipeline_mode = #tpu.pipeline_mode<synchronous>, transform_indices = @transform_3, window_bounds = array<i64: 256, 128>}, {pipeline_mode = #tpu.pipeline_mode<synchronous>, transform_indices = @transform_4, window_bounds = array<i64: 1, 128>}, {pipeline_mode = #tpu.pipeline_mode<synchronous>, transform_indices = @transform_5, window_bounds = array<i64: 128, 64>}, {pipeline_mode = #tpu.pipeline_mode<synchronous>, transform_indices = @transform_6, window_bounds = array<i64: 1, 64>}, {pipeline_mode = #tpu.pipeline_mode<synchronous>, transform_indices = @transform_7, window_bounds = array<i64: 1, 64>}, {pipeline_mode = #tpu.pipeline_mode<synchronous>, transform_indices = @transform_8, window_bounds = array<i64: 1, 1>}, {transform_indices = @transform_9, window_bounds = array<i64: 1, 8>}]} {
    %c0 = arith.constant 0 : index
    %c0_0 = arith.constant 0 : index
    %0 = vector.load %arg1[%c0, %c0_0] : memref<8x784xf32, #tpu.memory_space<vmem>>, vector<8x784xf32>
    %1 = arith.truncf %0 : vector<8x784xf32> to vector<8x784xbf16>
    %c0_1 = arith.constant 0 : index
    %c0_2 = arith.constant 0 : index
    %2 = vector.load %arg2[%c0_1, %c0_2] : memref<784x256xbf16, #tpu.memory_space<vmem>>, vector<784x256xbf16>
    %cst = arith.constant dense<0.000000e+00> : vector<8x256xf32>
    %3 = tpu.matmul %1, %2, %cst {dimension_numbers = #tpu.dot_dimension_numbers<[1], [0], [0], [1], [0, 0, 1, 1], [], []>} : vector<8x784xbf16>, vector<784x256xbf16>, vector<8x256xf32> -> vector<8x256xf32>
    %c0_3 = arith.constant 0 : index
    %c0_4 = arith.constant 0 : index
    %4 = vector.load %arg3[%c0_3, %c0_4] : memref<1x256xf32, #tpu.memory_space<vmem>>, vector<1x256xf32>
    %5 = vector.broadcast %4 : vector<1x256xf32> to vector<8x256xf32>
    %6 = arith.addf %3, %5 : vector<8x256xf32>
    %cst_5 = arith.constant 0.000000e+00 : f32
    %7 = vector.broadcast %cst_5 : f32 to vector<8x256xf32>
    %8 = arith.maximumf %6, %7 : vector<8x256xf32>
    %9 = arith.truncf %8 : vector<8x256xf32> to vector<8x256xbf16>
    %c0_6 = arith.constant 0 : index
    %c0_7 = arith.constant 0 : index
    %10 = vector.load %arg4[%c0_6, %c0_7] : memref<256x128xbf16, #tpu.memory_space<vmem>>, vector<256x128xbf16>
    %cst_8 = arith.constant dense<0.000000e+00> : vector<8x128xf32>
    %11 = tpu.matmul %9, %10, %cst_8 {dimension_numbers = #tpu.dot_dimension_numbers<[1], [0], [0], [1], [0, 0, 1, 1], [], []>} : vector<8x256xbf16>, vector<256x128xbf16>, vector<8x128xf32> -> vector<8x128xf32>
    %c0_9 = arith.constant 0 : index
    %c0_10 = arith.constant 0 : index
    %12 = vector.load %arg5[%c0_9, %c0_10] : memref<1x128xf32, #tpu.memory_space<vmem>>, vector<1x128xf32>
    %13 = vector.broadcast %12 : vector<1x128xf32> to vector<8x128xf32>
    %14 = arith.addf %11, %13 : vector<8x128xf32>
    %cst_11 = arith.constant 0.000000e+00 : f32
    %15 = vector.broadcast %cst_11 : f32 to vector<8x128xf32>
    %16 = arith.maximumf %14, %15 : vector<8x128xf32>
    %17 = arith.truncf %16 : vector<8x128xf32> to vector<8x128xbf16>
    %c0_12 = arith.constant 0 : index
    %c0_13 = arith.constant 0 : index
    %18 = vector.load %arg6[%c0_12, %c0_13] : memref<128x64xbf16, #tpu.memory_space<vmem>>, vector<128x64xbf16>
    %cst_14 = arith.constant dense<0.000000e+00> : vector<8x64xf32>
    %19 = tpu.matmul %17, %18, %cst_14 {dimension_numbers = #tpu.dot_dimension_numbers<[1], [0], [0], [1], [0, 0, 1, 1], [], []>} : vector<8x128xbf16>, vector<128x64xbf16>, vector<8x64xf32> -> vector<8x64xf32>
    %c0_15 = arith.constant 0 : index
    %c0_16 = arith.constant 0 : index
    %20 = vector.load %arg7[%c0_15, %c0_16] : memref<1x64xf32, #tpu.memory_space<vmem>>, vector<1x64xf32>
    %21 = vector.broadcast %20 : vector<1x64xf32> to vector<8x64xf32>
    %22 = arith.addf %19, %21 : vector<8x64xf32>
    %cst_17 = arith.constant 0.000000e+00 : f32
    %23 = vector.broadcast %cst_17 : f32 to vector<8x64xf32>
    %24 = arith.maximumf %22, %23 : vector<8x64xf32>
    %25 = arith.truncf %24 : vector<8x64xf32> to vector<8x64xbf16>
    %c0_18 = arith.constant 0 : index
    %c0_19 = arith.constant 0 : index
    %26 = vector.load %arg8[%c0_18, %c0_19] : memref<1x64xbf16, #tpu.memory_space<vmem>>, vector<1x64xbf16>
    %cst_20 = arith.constant dense<0.000000e+00> : vector<1x8xf32>
    %27 = tpu.matmul %26, %25, %cst_20 {dimension_numbers = #tpu.dot_dimension_numbers<[1], [1], [0], [0], [0, 0, 1, 0], [], []>} : vector<1x64xbf16>, vector<8x64xbf16>, vector<1x8xf32> -> vector<1x8xf32>
    %c0_21 = arith.constant 0 : index
    %c0_22 = arith.constant 0 : index
    %28 = vector.load %arg9[%c0_21, %c0_22] : memref<1x1xf32, #tpu.memory_space<vmem>>, vector<1x1xf32>
    %29 = vector.broadcast %28 : vector<1x1xf32> to vector<1x8xf32>
    %30 = arith.addf %27, %29 : vector<1x8xf32>
    %31 = arith.negf %30 : vector<1x8xf32>
    %32 = math.exp %31 : vector<1x8xf32>
    %cst_23 = arith.constant 1.000000e+00 : f32
    %33 = vector.broadcast %cst_23 : f32 to vector<1x8xf32>
    %34 = arith.addf %33, %32 : vector<1x8xf32>
    %35 = arith.divf %33, %34 : vector<1x8xf32>
    %c0_24 = arith.constant 0 : index
    %c0_25 = arith.constant 0 : index
    %36 = vector.load %arg10[%c0_24, %c0_25] : memref<1x8xf32, #tpu.memory_space<vmem>>, vector<1x8xf32>
    tpu.vector_store %arg10[%c0_24, %c0_25], %35 {strides = array<i32>} : memref<1x8xf32, #tpu.memory_space<vmem>>, vector<1x8xf32>,
    return
  }
  func.func @transform_0(%arg0: i32) -> (i32, i32) {
    %c0_i32 = arith.constant 0 : i32
    %c0_i32_0 = arith.constant 0 : i32
    return %arg0, %c0_i32 : i32, i32
  }
  func.func @transform_1(%arg0: i32) -> (i32, i32) {
    %c0_i32 = arith.constant 0 : i32
    %c0_i32_0 = arith.constant 0 : i32
    %c0_i32_1 = arith.constant 0 : i32
    return %c0_i32, %c0_i32_0 : i32, i32
  }
  func.func @transform_2(%arg0: i32) -> (i32, i32) {
    %c0_i32 = arith.constant 0 : i32
    %c0_i32_0 = arith.constant 0 : i32
    %c0_i32_1 = arith.constant 0 : i32
    return %c0_i32, %c0_i32_0 : i32, i32
  }
  func.func @transform_3(%arg0: i32) -> (i32, i32) {
    %c0_i32 = arith.constant 0 : i32
    %c0_i32_0 = arith.constant 0 : i32
    %c0_i32_1 = arith.constant 0 : i32
    return %c0_i32, %c0_i32_0 : i32, i32
  }
  func.func @transform_4(%arg0: i32) -> (i32, i32) {
    %c0_i32 = arith.constant 0 : i32
    %c0_i32_0 = arith.constant 0 : i32
    %c0_i32_1 = arith.constant 0 : i32
    return %c0_i32, %c0_i32_0 : i32, i32
  }
  func.func @transform_5(%arg0: i32) -> (i32, i32) {
    %c0_i32 = arith.constant 0 : i32
    %c0_i32_0 = arith.constant 0 : i32
    %c0_i32_1 = arith.constant 0 : i32
    return %c0_i32, %c0_i32_0 : i32, i32
  }
  func.func @transform_6(%arg0: i32) -> (i32, i32) {
    %c0_i32 = arith.constant 0 : i32
    %c0_i32_0 = arith.constant 0 : i32
    %c0_i32_1 = arith.constant 0 : i32
    return %c0_i32, %c0_i32_0 : i32, i32
  }
  func.func @transform_7(%arg0: i32) -> (i32, i32) {
    %c0_i32 = arith.constant 0 : i32
    %c0_i32_0 = arith.constant 0 : i32
    %c0_i32_1 = arith.constant 0 : i32
    return %c0_i32, %c0_i32_0 : i32, i32
  }
  func.func @transform_8(%arg0: i32) -> (i32, i32) {
    %c0_i32 = arith.constant 0 : i32
    %c0_i32_0 = arith.constant 0 : i32
    %c0_i32_1 = arith.constant 0 : i32
    return %c0_i32, %c0_i32_0 : i32, i32
  }
  func.func @transform_9(%arg0: i32) -> (i32, i32) {
    %c0_i32 = arith.constant 0 : i32
    %c0_i32_0 = arith.constant 0 : i32
    return %c0_i32, %arg0 : i32, i32
  }
}

</mosaic_0001>

<bundles_post_ra>
// kernel: tpu_custom_call.1
= control target key start
LH: loop header
LB: loop body
LE: loop exit
PB: predicated region body
PF: predicated region fallthrough
CT: control target
= control target key end

     0   :  { %s1855_s0 = inlined_call_operand.vmem [shape: f32[8,784], index: 0, kind: input, shape index: {}]   ;;  %s1856_s1 = inlined_call_operand.hbm [shape: bf16[784,256], index: 1, kind: input, shape index: {}]   ;;  %s1857_s2 = inlined_call_operand.vmem [shape: f32[1,256], index: 2, kind: input, shape index: {}]   ;;  %s1858_s3 = inlined_call_operand.hbm [shape: bf16[256,128], index: 3, kind: input, shape index: {}]   ;;  %s1859_s4 = inlined_call_operand.vmem [shape: f32[1,128], index: 4, kind: input, shape index: {}]   ;;  %s1860_s5 = inlined_call_operand.vmem [shape: bf16[128,64], index: 5, kind: input, shape index: {}]   ;;  %s1861_s6 = inlined_call_operand.vmem [shape: f32[1,64], index: 6, kind: input, shape index: {}]   ;;  %s1862_s7 = inlined_call_operand.vmem [shape: bf16[1,64], index: 7, kind: input, shape index: {}]   ;;  %s1863_s8 = inlined_call_operand.<no memory space> [shape: f32[1,1], index: 8, kind: input, shape index: {}]   ;;  %s1864_s9 = inlined_call_operand.hbm [shape: f32[1,8], index: 9, kind: output, shape index: {}]  }
   0x1   :  { %v14_v0 = vstv %s1863_s8 }
   0x2   :  { %15 = vst [vmem:[#allocation2] sm:$0x1] %v14_v0 }
   0x3   :  { %16 = vsyncpa [#allocation4], 0 }
   0x4   :  { %17 = vsyncpa [#allocation7], 0 }
   0x5   :  { %18 = vsyncpa [#allocation5], 0  ;;  %s1678_s11 = smov [#allocation3]   ;;  %s1606_s15 = scalar_lea.hbm %s1856_s1, 12544 }
   0x6   :  { %s26_s12 = sshll.u32 %s1678_s11, 4  ;;  %p1607_p0 = scmp.ne.s32.totalorder %s1856_s1, %s1606_s15  ;;  %s27_s12 = int_to_ptr.vmem [resolvable:$true] %s26_s12 }
   0x7   :  { %p1610_p1 = scmp.lt.u32.totalorder %s1606_s15, %s1856_s1 }
   0x9   :  { %p1612_p2 = pnand %p1610_p1, %p1607_p0 }
   0xb   :  { %1615 = shalt.err (!%p1612_p2)
}
   0xc   :  { %s1616_s8 = scalar_lea.vmem %s27_s12, 12544  ;;  %p1621_p4 = scmp.lt.s32.totalorder %s27_s12, %s27_s12 }
   0xd   :  { %p1617_p3 = scmp.ne.s32.totalorder %s27_s12, %s1616_s8  ;;  %p1622_p5 = scmp.lt.s32.totalorder %s1616_s8, %s1616_s8 }
   0xf   :  { %p1623_p6 = por %p1622_p5, %p1621_p4 }
  0x11   :  { %p1624_p7 = pnand %p1623_p6, %p1617_p3 }
  0x13   :  { %1627 = shalt.err (!%p1624_p7)
}
  0x14   :  { %s1679_s20 = smov 128   ;;  %s1680_s21 = smov 8  }
  0x15   :  { %32 = dma.hbm_to_vmem [thread:$0]  %s1856_s1, 12544, %s27_s12, [#allocation4], %s1679_s20, %s1679_s20, %s1680_s21  }
  0x16   :  { %s1681_s24 = smov [#allocation6]   ;;  %s1628_s28 = scalar_lea.hbm %s1858_s3, 2048 }
  0x17   :  { %s40_s25 = sshll.u32 %s1681_s24, 4  ;;  %p1629_p8 = scmp.ne.s32.totalorder %s1858_s3, %s1628_s28  ;;  %s41_s25 = int_to_ptr.vmem [resolvable:$true] %s40_s25 }
  0x18   :  { %p1632_p9 = scmp.lt.u32.totalorder %s1628_s28, %s1858_s3 }
  0x1a   :  { %p1634_p10 = pnand %p1632_p9, %p1629_p8 }
  0x1c   :  { %1637 = shalt.err (!%p1634_p10)
}
  0x1d   :  { %s1638_s13 = scalar_lea.vmem %s41_s25, 2048  ;;  %p1643_p12 = scmp.lt.s32.totalorder %s41_s25, %s41_s25 }
  0x1e   :  { %p1639_p11 = scmp.ne.s32.totalorder %s41_s25, %s1638_s13  ;;  %p1644_p13 = scmp.lt.s32.totalorder %s1638_s13, %s1638_s13 }
  0x20   :  { %p1645_p0 = por %p1644_p13, %p1643_p12 }
  0x22   :  { %p1646_p1 = pnand %p1645_p0, %p1639_p11 }
  0x24   :  { %1649 = shalt.err (!%p1646_p1)
}
  0x25   :  { %s1682_s1 = smov 64   ;;  %s1683_s12 = smov 4  }
  0x26   :  { %46 = dma.hbm_to_vmem [thread:$0]  %s1858_s3, 2048, %s41_s25, [#allocation7], %s1682_s1, %s1682_s1, %s1683_s12  }
  0x27   :  { %1672 = dma.done.wait [#allocation4], 12544  }
  0x28   :  { %1673 = vsyncadd [#allocation4], 4294954752 }
  0x29   :  { %1674 = dma.done.wait [#allocation7], 2048  }
  0x2a   :  { %1675 = vsyncadd [#allocation7], 4294965248  ;;  %v1431_v1 = vld [vmem:[#allocation3 + $0x104] ss:$8 sps:$4 sm:$0xff]   ;;  %v1433_v2 = vld [vmem:[#allocation3 + $0x100] ss:$8 sps:$4 sm:$0xff]  }
  0x2b   :  { %723 = vmatprep.subr.bf16.mxu0 %v1431_v1  ;;  %v1434_v3 = vld [vmem:[#allocation3 + $0x114] ss:$8 sps:$4 sm:$0xff]   ;;  %v1436_v4 = vld [vmem:[#allocation3 + $0x110] ss:$8 sps:$4 sm:$0xff]   ;;  %v1437_v5 = vld [vmem:[#allocation3 + $0x124] ss:$8 sps:$4 sm:$0xff]  }
  0x2c   :  { %724 = vmatpush1.bf16.msra.mxu0 %v1433_v2  ;;  %v1684_v6 = vmov 0   ;;  %v1439_v7 = vld [vmem:[#allocation3 + $0x120] ss:$8 sps:$4 sm:$0xff]   ;;  %v1440_v8 = vld [vmem:[#allocation3 + $0x134] ss:$8 sps:$4 sm:$0xff]   ;;  %vm678_vm0 = vcmask 130048  }
  0x2d   :  { %725 = vmatprep.subr.bf16.mxu0 %v1434_v3  ;;  %1430 = vset.pattern.permute.xlu0 %v1684_v6  ;;  %v1442_v9 = vld [vmem:[#allocation3 + $0x130] ss:$8 sps:$4 sm:$0xff]   ;;  %v1443_v10 = vld [vmem:[#allocation3 + $0x144] ss:$8 sps:$4 sm:$0xff]   ;;  %v1445_v11 = vld [vmem:[#allocation3 + $0x140] ss:$8 sps:$4 sm:$0xff]  }
  0x2e   :  { %v1446_v12 = vld [vmem:[#allocation3 + $0x154] ss:$8 sps:$4 sm:$0xff]   ;;  %v1448_v13 = vld [vmem:[#allocation3 + $0x150] ss:$8 sps:$4 sm:$0xff]   ;;  %v1449_v14 = vld [vmem:[#allocation3 + $0x164] ss:$8 sps:$4 sm:$0xff]  }
  0x2f   :  { %v67_v15 = vld [vmem:[%s1855_s0 + $0x18] sm:$0xff]  ;;  %v1451_v17 = vld [vmem:[#allocation3 + $0x160] ss:$8 sps:$4 sm:$0xff]   ;;  %v1485_v19 = vld [vmem:[#allocation3 + $0x4] ss:$8 sps:$4 sm:$0xff]   ;;  %vm1686_vm1 = vmmov 0  }
  0x30   :  { %726 = vmatpush1.bf16.msra.mxu0 %v1436_v4  ;;  %v74_v16 = vpack.c.bf16 %v67_v15, %v67_v15  ;;  %v1452_v18 = vld [vmem:[#allocation3 + $0x174] ss:$8 sps:$4 sm:$0xff]   ;;  %v1487_v20 = vld [vmem:[#allocation3] ss:$8 sps:$4 sm:$0xff]   ;;  %v1454_v21 = vld [vmem:[#allocation3 + $0x170] ss:$8 sps:$4 sm:$0xff]   ;;  %682 = vmatprep.subr.bf16.mxu1 %v1485_v19 }
  0x31   :  { %727 = vmatprep.subr.bf16.mxu0 %v1437_v5  ;;  %v1455_v22 = vld [vmem:[#allocation3 + $0x184] ss:$8 sps:$4 sm:$0xff]   ;;  %683 = vmatpush1.bf16.msra.mxu1 %v1487_v20  ;;  %v1491_v23 = vld [vmem:[#allocation3 + $0x14] ss:$8 sps:$4 sm:$0xff]   ;;  %v1493_v24 = vld [vmem:[#allocation3 + $0x10] ss:$8 sps:$4 sm:$0xff]  }
  0x32   :  { %755 = vmatprep.mubr.bf16.mxu0 %v74_v16  ;;  %684 = vmatprep.subr.bf16.mxu1 %v1491_v23  ;;  %v1497_v25 = vld [vmem:[#allocation3 + $0x24] ss:$8 sps:$4 sm:$0xff]   ;;  %v1457_v26 = vld [vmem:[#allocation3 + $0x180] ss:$8 sps:$4 sm:$0xff]   ;;  %v1458_v27 = vld [vmem:[#allocation3 + $0x194] ss:$8 sps:$4 sm:$0xff]  }
  0x33   :  { %v1499_v28 = vld [vmem:[#allocation3 + $0x20] ss:$8 sps:$4 sm:$0xff]   ;;  %v1503_v29 = vld [vmem:[#allocation3 + $0x34] ss:$8 sps:$4 sm:$0xff]   ;;  %v1460_v30 = vld [vmem:[#allocation3 + $0x190] ss:$8 sps:$4 sm:$0xff]  }
  0x34   :  { %728 = vmatpush1.bf16.msra.mxu0 %v1439_v7  ;;  %v1461_v31 = vld [vmem:[#allocation3 + $0x1a4] ss:$8 sps:$4 sm:$0xff]   ;;  %v1505_v32 = vld [vmem:[#allocation3 + $0x30] ss:$8 sps:$4 sm:$0xff]   ;;  %v1463_v34 = vld [vmem:[#allocation3 + $0x1a0] ss:$8 sps:$4 sm:$0xff]  }
  0x35   :  { %729 = vmatprep.subr.bf16.mxu0 %v1440_v8  ;;  %685 = vmatpush1.bf16.msra.mxu1 %v1493_v24  ;;  %v1509_v33 = vld [vmem:[#allocation3 + $0x44] ss:$8 sps:$4 sm:$0xff]   ;;  %v1464_v35 = vld [vmem:[#allocation3 + $0x1b4] ss:$8 sps:$4 sm:$0xff]   ;;  %v1511_v36 = vld [vmem:[#allocation3 + $0x40] ss:$8 sps:$4 sm:$0xff]  }
  0x36   :  { %686 = vmatprep.subr.bf16.mxu1 %v1497_v25  ;;  %v1515_v37 = vld [vmem:[#allocation3 + $0x54] ss:$8 sps:$4 sm:$0xff]   ;;  %v1466_v38 = vld [vmem:[#allocation3 + $0x1b0] ss:$8 sps:$4 sm:$0xff]   ;;  %v1467_v39 = vld [vmem:[#allocation3 + $0x1c4] ss:$8 sps:$4 sm:$0xff]  }
  0x37   :  { %v1517_v40 = vld [vmem:[#allocation3 + $0x50] ss:$8 sps:$4 sm:$0xff]   ;;  %v1521_v41 = vld [vmem:[#allocation3 + $0x64] ss:$8 sps:$4 sm:$0xff]   ;;  %v1469_v42 = vld [vmem:[#allocation3 + $0x1c0] ss:$8 sps:$4 sm:$0xff]  }
  0x38   :  { %730 = vmatpush1.bf16.msra.mxu0 %v1442_v9  ;;  %v1470_v43 = vld [vmem:[#allocation3 + $0x1d4] ss:$8 sps:$4 sm:$0xff]   ;;  %v1523_v44 = vld [vmem:[#allocation3 + $0x60] ss:$8 sps:$4 sm:$0xff]   ;;  %v1472_v46 = vld [vmem:[#allocation3 + $0x1d0] ss:$8 sps:$4 sm:$0xff]  }
  0x39   :  { %731 = vmatprep.subr.bf16.mxu0 %v1443_v10  ;;  %687 = vmatpush1.bf16.msra.mxu1 %v1499_v28  ;;  %v1527_v45 = vld [vmem:[#allocation3 + $0x74] ss:$8 sps:$4 sm:$0xff]   ;;  %v1473_v47 = vld [vmem:[#allocation3 + $0x1e4] ss:$8 sps:$4 sm:$0xff]   ;;  %v1529_v48 = vld [vmem:[#allocation3 + $0x70] ss:$8 sps:$4 sm:$0xff]  }
  0x3a   :  { %688 = vmatprep.subr.bf16.mxu1 %v1503_v29  ;;  %v1533_v49 = vld [vmem:[#allocation3 + $0x84] ss:$8 sps:$4 sm:$0xff]   ;;  %v1475_v50 = vld [vmem:[#allocation3 + $0x1e0] ss:$8 sps:$4 sm:$0xff]   ;;  %v1476_v51 = vld [vmem:[#allocation3 + $0x1f4] ss:$8 sps:$4 sm:$0xff]  }
  0x3b   :  { %v1535_v52 = vld [vmem:[#allocation3 + $0x80] ss:$8 sps:$4 sm:$0xff]   ;;  %v1539_v53 = vld [vmem:[#allocation3 + $0x94] ss:$8 sps:$4 sm:$0xff]   ;;  %v1478_v54 = vld [vmem:[#allocation3 + $0x1f0] ss:$8 sps:$4 sm:$0xff]  }
  0x3c   :  { %732 = vmatpush1.bf16.msra.mxu0 %v1445_v11  ;;  %v66_v55 = vld [vmem:[%s1855_s0 + $0x10] sm:$0xff]  ;;  %v1479_v60 = vld [vmem:[#allocation3 + $0x200] ss:$8 sps:$4 sm:$0xff]   ;;  %vm1151_vm2 = vcmask 523264   ;;  %vm1204_vm3 = vcmask 57344  }
  0x3d   :  { %733 = vmatprep.subr.bf16.mxu0 %v1446_v12  ;;  %689 = vmatpush1.bf16.msra.mxu1 %v1505_v32  ;;  %v1481_v56 = vld [vmem:[#allocation3 + $0x204] ss:$8 sps:$4 sm:$0xff]   ;;  %v1541_v57 = vld [vmem:[#allocation3 + $0x90] ss:$8 sps:$4 sm:$0xff]   ;;  %v73_v59 = vpack.c.bf16 %v66_v55, %v66_v55  ;;  %v1484_v61 = vld [vmem:[#allocation3 + $0x214] ss:$8 sps:$4 sm:$0xff]  }
  0x3e   :  { %690 = vmatprep.subr.bf16.mxu1 %v1509_v33  ;;  %v1545_v58 = vld [vmem:[#allocation3 + $0xa4] ss:$8 sps:$4 sm:$0xff]   ;;  %v1547_v63 = vld [vmem:[#allocation3 + $0xa0] ss:$8 sps:$4 sm:$0xff]   ;;  %v1551_v1 = vld [vmem:[#allocation3 + $0xb4] ss:$8 sps:$4 sm:$0xff]  }
  0x3f   :  { %v69_v62 = vld [vmem:[%s1855_s0 + $0x28] sm:$0xff]  ;;  %v1482_v3 = vld [vmem:[#allocation3 + $0x210] ss:$8 sps:$4 sm:$0xff]   ;;  %v1496_v10 = vld [vmem:[#allocation3 + $0x234] ss:$8 sps:$4 sm:$0xff]  }
  0x40   :  { %734 = vmatpush1.bf16.msra.mxu0 %v1448_v13  ;;  %v76_v0 = vpack.c.bf16 %v69_v62, %v69_v62  ;;  %v65_v2 = vld [vmem:[%s1855_s0 + $0x8] sm:$0xff]  ;;  %v1553_v7 = vld [vmem:[#allocation3 + $0xb0] ss:$8 sps:$4 sm:$0xff]   ;;  %v1563_v12 = vld [vmem:[#allocation3 + $0xd4] ss:$8 sps:$4 sm:$0xff]  }
  0x41   :  { %735 = vmatprep.subr.bf16.mxu0 %v1449_v14  ;;  %691 = vmatpush1.bf16.msra.mxu1 %v1511_v36  ;;  %v1490_v4 = vld [vmem:[#allocation3 + $0x224] ss:$8 sps:$4 sm:$0xff]   ;;  %v72_v5 = vpack.c.bf16 %v65_v2, %v65_v2  ;;  %v1488_v9 = vld [vmem:[#allocation3 + $0x220] ss:$8 sps:$4 sm:$0xff]   ;;  %v1494_v13 = vld [vmem:[#allocation3 + $0x230] ss:$8 sps:$4 sm:$0xff]  }
  0x42   :  { %692 = vmatprep.subr.bf16.mxu1 %v1515_v37  ;;  %v1557_v8 = vld [vmem:[#allocation3 + $0xc4] ss:$8 sps:$4 sm:$0xff]   ;;  %v1559_v11 = vld [vmem:[#allocation3 + $0xc0] ss:$8 sps:$4 sm:$0xff]   ;;  %v1565_v15 = vld [vmem:[#allocation3 + $0xd0] ss:$8 sps:$4 sm:$0xff]  }
  0x43   :  { %714 = vmatprep.mubr.bf16.mxu1 %v72_v5  ;;  %v1502_v14 = vld [vmem:[#allocation3 + $0x244] ss:$8 sps:$4 sm:$0xff]   ;;  %v1500_v16 = vld [vmem:[#allocation3 + $0x240] ss:$8 sps:$4 sm:$0xff]   ;;  %v1575_v20 = vld [vmem:[#allocation3 + $0xf4] ss:$8 sps:$4 sm:$0xff]  }
  0x44   :  { %736 = vmatpush1.bf16.msra.mxu0 %v1451_v17  ;;  %v1569_v17 = vld [vmem:[#allocation3 + $0xe4] ss:$8 sps:$4 sm:$0xff]   ;;  %v1571_v19 = vld [vmem:[#allocation3 + $0xe0] ss:$8 sps:$4 sm:$0xff]   ;;  %v1577_v23 = vld [vmem:[#allocation3 + $0xf0] ss:$8 sps:$4 sm:$0xff]  }
  0x45   :  { %737 = vmatprep.subr.bf16.mxu0 %v1452_v18  ;;  %693 = vmatpush1.bf16.msra.mxu1 %v1517_v40  ;;  %v1508_v18 = vld [vmem:[#allocation3 + $0x254] ss:$8 sps:$4 sm:$0xff]   ;;  %v1526_v32 = vld [vmem:[#allocation3 + $0x284] ss:$8 sps:$4 sm:$0xff]  }
  0x46   :  { %694 = vmatprep.subr.bf16.mxu1 %v1521_v41  ;;  %v64_v24 = vld [vmem:[%s1855_s0] sm:$0xff]  ;;  %v1578_v25 = vld [vmem:[#allocation6 + $0x40] sm:$0xff]   ;;  %v1585_v41 = vld [vmem:[#allocation6 + $0x18] sm:$0xff]  }
  0x47   :  { %v1520_v28 = vld [vmem:[#allocation3 + $0x274] ss:$8 sps:$4 sm:$0xff]   ;;  %v1583_v37 = vld [vmem:[#allocation6 + $0x10] sm:$0xff]   ;;  %v1593_v2 = vld [vmem:[#allocation6 + $0x38] sm:$0xff]  }
  0x48   :  { %738 = vmatpush1.bf16.msra.mxu0 %v1454_v21  ;;  %v1506_v21 = vld [vmem:[#allocation3 + $0x250] ss:$8 sps:$4 sm:$0xff]   ;;  %v1532_v36 = vld [vmem:[#allocation3 + $0x294] ss:$8 sps:$4 sm:$0xff]   ;;  %v1538_v40 = vld [vmem:[#allocation3 + $0x2a4] ss:$8 sps:$4 sm:$0xff]  }
  0x49   :  { %739 = vmatprep.subr.bf16.mxu0 %v1455_v22  ;;  %695 = vmatpush1.bf16.msra.mxu1 %v1523_v44  ;;  %v1514_v22 = vld [vmem:[#allocation3 + $0x264] ss:$8 sps:$4 sm:$0xff]   ;;  %v1579_v29 = vld [vmem:[#allocation6] sm:$0xff]   ;;  %v1581_v33 = vld [vmem:[#allocation6 + $0x8] sm:$0xff]  }
  0x4a   :  { %696 = vmatprep.subr.bf16.mxu1 %v1527_v45  ;;  %v1544_v44 = vld [vmem:[#allocation3 + $0x2b4] ss:$8 sps:$4 sm:$0xff]  }
  0x4b   :  { %v1587_v45 = vld [vmem:[#allocation6 + $0x20] sm:$0xff]   ;;  %v68_v55 = vld [vmem:[%s1855_s0 + $0x20] sm:$0xff] }
  0x4c   :  { %740 = vmatpush1.bf16.msra.mxu0 %v1457_v26  ;;  %v1512_v26 = vld [vmem:[#allocation3 + $0x260] ss:$8 sps:$4 sm:$0xff]   ;;  %v1589_v62 = vld [vmem:[#allocation6 + $0x28] sm:$0xff]  }
  0x4d   :  { %741 = vmatprep.subr.bf16.mxu0 %v1458_v27  ;;  %697 = vmatpush1.bf16.msra.mxu1 %v1529_v48  ;;  %v71_v27 = vpack.c.bf16 %v64_v24, %v64_v24  ;;  %v1548_v48 = vld [vmem:[#allocation3 + $0x2c0] ss:$8 sps:$4 sm:$0xff]  }
  0x4e   :  { %698 = vmatprep.subr.bf16.mxu1 %v1533_v49  ;;  %v1556_v49 = vld [vmem:[#allocation3 + $0x2d4] ss:$8 sps:$4 sm:$0xff]  }
  0x50   :  { %742 = vmatpush1.bf16.msra.mxu0 %v1460_v30  ;;  %v1580_v30 = vld [vmem:[#allocation6 + $0x48] sm:$0xff]  }
  0x51   :  { %743 = vmatprep.subr.bf16.mxu0 %v1461_v31  ;;  %699 = vmatpush1.bf16.msra.mxu1 %v1535_v52  ;;  %v1518_v31 = vld [vmem:[#allocation3 + $0x270] ss:$8 sps:$4 sm:$0xff]   ;;  %v1560_v52 = vld [vmem:[#allocation3 + $0x2e0] ss:$8 sps:$4 sm:$0xff]  }
  0x52   :  { %700 = vmatprep.subr.bf16.mxu1 %v1539_v53  ;;  %v1568_v53 = vld [vmem:[#allocation3 + $0x2f4] ss:$8 sps:$4 sm:$0xff]  }
  0x54   :  { %744 = vmatpush1.bf16.msra.mxu0 %v1463_v34  ;;  %v1582_v34 = vld [vmem:[#allocation6 + $0x50] sm:$0xff]  }
  0x55   :  { %745 = vmatprep.subr.bf16.mxu0 %v1464_v35  ;;  %701 = vmatpush1.bf16.msra.mxu1 %v1541_v57  ;;  %v1524_v35 = vld [vmem:[#allocation3 + $0x280] ss:$8 sps:$4 sm:$0xff]   ;;  %v75_v57 = vpack.c.bf16 %v68_v55, %v68_v55 }
  0x56   :  { %702 = vmatprep.subr.bf16.mxu1 %v1545_v58  ;;  %v1572_v58 = vld [vmem:[#allocation3 + $0x300] ss:$8 sps:$4 sm:$0xff]  }
  0x58   :  { %746 = vmatpush1.bf16.msra.mxu0 %v1466_v38  ;;  %v1584_v38 = vld [vmem:[#allocation6 + $0x58] sm:$0xff]  }
  0x59   :  { %747 = vmatprep.subr.bf16.mxu0 %v1467_v39  ;;  %703 = vmatpush1.bf16.msra.mxu1 %v1547_v63  ;;  %v1530_v39 = vld [vmem:[#allocation3 + $0x290] ss:$8 sps:$4 sm:$0xff]   ;;  %v1590_v63 = vld [vmem:[#allocation6 + $0x70] sm:$0xff]  }
  0x5a   :  { %704 = vmatprep.subr.bf16.mxu1 %v1551_v1  ;;  %v1592_v1 = vld [vmem:[#allocation6 + $0x78] sm:$0xff]  }
  0x5c   :  { %748 = vmatpush1.bf16.msra.mxu0 %v1469_v42  ;;  %v1586_v42 = vld [vmem:[#allocation6 + $0x60] sm:$0xff]  }
  0x5d   :  { %749 = vmatprep.subr.bf16.mxu0 %v1470_v43  ;;  %705 = vmatpush1.bf16.msra.mxu1 %v1553_v7  ;;  %v1536_v43 = vld [vmem:[#allocation3 + $0x2a0] ss:$8 sps:$4 sm:$0xff]  }
  0x5e   :  { %706 = vmatprep.subr.bf16.mxu1 %v1557_v8  ;;  %v178_v8 = vlaneseq }
  0x60   :  { %750 = vmatpush1.bf16.msra.mxu0 %v1472_v46  ;;  %v1542_v46 = vld [vmem:[#allocation3 + $0x2b0] ss:$8 sps:$4 sm:$0xff]  }
  0x61   :  { %751 = vmatprep.subr.bf16.mxu0 %v1473_v47  ;;  %707 = vmatpush1.bf16.msra.mxu1 %v1559_v11  ;;  %v1550_v47 = vld [vmem:[#allocation3 + $0x2c4] ss:$8 sps:$4 sm:$0xff]   ;;  %v176_v11 = vld [vmem:[%s1857_s2] sm:$0x3] }
  0x62   :  { %708 = vmatprep.subr.bf16.mxu1 %v1563_v12 }
  0x64   :  { %752 = vmatpush1.bf16.msra.mxu0 %v1475_v50  ;;  %v1554_v50 = vld [vmem:[#allocation3 + $0x2d0] ss:$8 sps:$4 sm:$0xff]  }
  0x65   :  { %753 = vmatprep.subr.bf16.mxu0 %v1476_v51  ;;  %709 = vmatpush1.bf16.msra.mxu1 %v1565_v15  ;;  %v1562_v51 = vld [vmem:[#allocation3 + $0x2e4] ss:$8 sps:$4 sm:$0xff]  }
  0x66   :  { %710 = vmatprep.subr.bf16.mxu1 %v1569_v17 }
  0x68   :  { %754 = vmatpush1.bf16.msra.mxu0 %v1478_v54  ;;  %v1566_v54 = vld [vmem:[#allocation3 + $0x2f0] ss:$8 sps:$4 sm:$0xff]  }
  0x69   :  { %764 = vmatprep.subr.bf16.mxu0 %v1481_v56  ;;  %711 = vmatpush1.bf16.msra.mxu1 %v1571_v19  ;;  %v1574_v56 = vld [vmem:[#allocation3 + $0x304] ss:$8 sps:$4 sm:$0xff]  }
  0x6a   :  { %712 = vmatprep.subr.bf16.mxu1 %v1575_v20 }
  0x6b   :  { %756 = vmatmul.mubr.bf16.vlgmr.msra.gmra.mrb[0].mxu0 %v73_v59  ;;  %v70_v59 = vld [vmem:[%s1855_s0 + $0x30] sm:$0xff] }
  0x6c   :  { %765 = vmatpush1.bf16.msra.mxu0 %v1479_v60  ;;  %796 = vmatprep.mubr.bf16.mxu0 %v76_v0  ;;  %v77_v60 = vpack.c.bf16 %v70_v59, %v70_v59  ;;  %v1591_v0 = vld [vmem:[#allocation6 + $0x30] sm:$0xff]  }
  0x6d   :  { %766 = vmatprep.subr.bf16.mxu0 %v1484_v61  ;;  %713 = vmatpush1.bf16.msra.mxu1 %v1577_v23  ;;  %v1588_v61 = vld [vmem:[#allocation6 + $0x68] sm:$0xff]  }
  0x6e   :  { %1349 = vmatprep.subr.bf16.mxu1 %v1578_v25 }
  0x70   :  { %767 = vmatpush1.bf16.msra.mxu0 %v1482_v3  ;;  %715 = vmatmul.mubr.bf16.vlgmr.msra.gmra.mrb[0].mxu1 %v71_v27 }
  0x71   :  { %768 = vmatprep.subr.bf16.mxu0 %v1490_v4  ;;  %1350 = vmatpush3.bf16.msra.mxu1 %v1579_v29  ;;  %v1596_v29 = vld [vmem:[%s1860_s5 + $0x10] sm:$0xff]  }
  0x72   :  { %1351 = vmatprep.subr.bf16.mxu1 %v1580_v30  ;;  %v1597_v30 = vld [vmem:[%s1860_s5 + $0x18] sm:$0xff]  }
  0x74   :  { %769 = vmatpush1.bf16.msra.mxu0 %v1488_v9  ;;  %v1789_v9 = vshrl.u32 %v178_v8, 7 }
  0x75   :  { %770 = vmatprep.subr.bf16.mxu0 %v1496_v10  ;;  %1352 = vmatpush3.bf16.msra.mxu1 %v1581_v33  ;;  %v1600_v33 = vld [vmem:[%s1860_s5 + $0x30] sm:$0xff]  }
  0x76   :  { %1353 = vmatprep.subr.bf16.mxu1 %v1582_v34  ;;  %v180_v10 = vsub.s32 0, %v1789_v9  ;;  %v184_v12 = vsub.s32 1, %v1789_v9  ;;  %v1601_v34 = vld [vmem:[%s1860_s5 + $0x38] sm:$0xff]  }
  0x78   :  { %771 = vmatpush1.bf16.msra.mxu0 %v1494_v13  ;;  %v181_v13 = vrot.slane %v176_v11, %v180_v10 }
  0x79   :  { %772 = vmatprep.subr.bf16.mxu0 %v1502_v14  ;;  %1354 = vmatpush3.bf16.msra.mxu1 %v1583_v37  ;;  %v185_v14 = vrot.slane %v176_v11, %v184_v12 }
  0x7a   :  { %1355 = vmatprep.subr.bf16.mxu1 %v1584_v38 }
  0x7c   :  { %773 = vmatpush1.bf16.msra.mxu0 %v1500_v16 }
  0x7d   :  { %774 = vmatprep.subr.bf16.mxu0 %v1508_v18  ;;  %1356 = vmatpush3.bf16.msra.mxu1 %v1585_v41 }
  0x7e   :  { %1357 = vmatprep.subr.bf16.mxu1 %v1586_v42 }
  0x80   :  { %775 = vmatpush1.bf16.msra.mxu0 %v1506_v21 }
  0x81   :  { %776 = vmatprep.subr.bf16.mxu0 %v1514_v22  ;;  %1358 = vmatpush3.bf16.msra.mxu1 %v1587_v45  ;;  %v1338_v45 = vld [vmem:[%s1861_s6] ss:$0 sm:$0xff]  ;;  %s1687_s6 = smov [#allocation8]  }
  0x82   :  { %1359 = vmatprep.subr.bf16.mxu1 %v1588_v61  ;;  %s1212_s24 = sshll.u32 %s1687_s6, 4  ;;  %s1213_s24 = int_to_ptr.vmem [resolvable:$true] %s1212_s24 }
  0x83   :  { %s1654_s25 = scalar_lea.vmem %s1213_s24, 32  ;;  %p1655_p3 = scmp.lt.s32.totalorder %s1213_s24, %s1213_s24 }
  0x84   :  { %777 = vmatpush1.bf16.msra.mxu0 %v1512_v26  ;;  %v1594_v26 = vld [vmem:[%s1860_s5] sm:$0xff]  }
  0x85   :  { %778 = vmatprep.subr.bf16.mxu0 %v1520_v28  ;;  %1360 = vmatpush3.bf16.msra.mxu1 %v1589_v62  ;;  %v1595_v28 = vld [vmem:[%s1860_s5 + $0x8] sm:$0xff]  }
  0x86   :  { %1361 = vmatprep.subr.bf16.mxu1 %v1590_v63 }
  0x88   :  { %779 = vmatpush1.bf16.msra.mxu0 %v1518_v31  ;;  %v1598_v31 = vld [vmem:[%s1860_s5 + $0x20] sm:$0xff]  }
  0x89   :  { %780 = vmatprep.subr.bf16.mxu0 %v1526_v32  ;;  %1362 = vmatpush3.bf16.msra.mxu1 %v1591_v0  ;;  %v1599_v32 = vld [vmem:[%s1860_s5 + $0x28] sm:$0xff]  }
  0x8a   :  { %1363 = vmatprep.subr.bf16.mxu1 %v1592_v1 }
  0x8c   :  { %781 = vmatpush1.bf16.msra.mxu0 %v1524_v35 }
  0x8d   :  { %782 = vmatprep.subr.bf16.mxu0 %v1532_v36  ;;  %1364 = vmatpush3.bf16.msra.mxu1 %v1593_v2  ;;  %v1321_v36 = vld [vmem:[%s1859_s4] ss:$0 sm:$0xff] }
  0x90   :  { %783 = vmatpush1.bf16.msra.mxu0 %v1530_v39 }
  0x91   :  { %784 = vmatprep.subr.bf16.mxu0 %v1538_v40 }
  0x94   :  { %785 = vmatpush1.bf16.msra.mxu0 %v1536_v43 }
  0x95   :  { %786 = vmatprep.subr.bf16.mxu0 %v1544_v44  ;;  %v1141_v44 = vld [vmem:[#allocation2] sm:$0x1] }
  0x96   :  { %1144 = vperm.xlu0 %1430, %v1141_v44  }
  0x98   :  { %787 = vmatpush1.bf16.msra.mxu0 %v1542_v46 }
  0x99   :  { %788 = vmatprep.subr.bf16.mxu0 %v1550_v47 }
  0x9c   :  { %789 = vmatpush1.bf16.msra.mxu0 %v1548_v48 }
  0x9d   :  { %790 = vmatprep.subr.bf16.mxu0 %v1556_v49 }
  0xa0   :  { %791 = vmatpush1.bf16.msra.mxu0 %v1554_v50 }
  0xa1   :  { %792 = vmatprep.subr.bf16.mxu0 %v1562_v51 }
  0xa4   :  { %793 = vmatpush1.bf16.msra.mxu0 %v1560_v52 }
  0xa5   :  { %794 = vmatprep.subr.bf16.mxu0 %v1568_v53 }
  0xa8   :  { %795 = vmatpush1.bf16.msra.mxu0 %v1566_v54  ;;  %v1140_v54 = vld [vmem:[%s1862_s7] sm:$0x1]  ;;  %s1650_s7 = scalar_lea.vmem %s1213_s24, 16 }
  0xa9   :  { %805 = vmatprep.subr.bf16.mxu0 %v1574_v56  ;;  %p1651_p2 = scmp.ne.s32.totalorder %s1213_s24, %s1650_s7  ;;  %p1656_p4 = scmp.lt.s32.totalorder %s1654_s25, %s1650_s7 }
  0xab   :  { %797 = vmatmul.mubr.bf16.vlgmr.msra.gmra.mrb[0].mxu0 %v75_v57  ;;  %p1657_p5 = por %p1656_p4, %p1655_p3 }
  0xac   :  { %806 = vmatpush1.bf16.msra.mxu0 %v1572_v58  ;;  %837 = vmatprep.mubr.bf16.mxu0 %v1684_v6  ;;  %v1685_v6 = vmov 0.0  }
  0xad   :  { %1382 = vmatprep.subr.bf16.mxu1 %v1685_v6  ;;  %p1658_p6 = pnand %p1657_p5, %p1651_p2 }
  0xb7   :  { %1320 = vmatmul.mubr.msk.bf16.vlgmr.msra.gmra.mrb[0].mxu0 %vm678_vm0, %v77_v60 }
 0x115   :  { %v1145_v55 = vpop.permute.xlu0 %1144 }
 0x116   :  { %v1150_v56 = vrot.slane %v1145_v55, %v180_v10 }
 0x143   :  { %v716_v3 = vpop.f32.mrb[0].mxu1 }
 0x144   :  { %v718_v4 = vpop.f32.mrb[1].mxu1  ;;  %v717_v15 = vadd.f32 %v716_v3, %v181_v13 }
 0x145   :  { %v720_v5 = vpop.f32.mrb[2].mxu1  ;;  %v719_v16 = vadd.f32 %v718_v4, %v185_v14 }
 0x146   :  { %v721_v7 = vpop.f32.mrb[3].mxu1 }
 0x18a   :  { %v839_v17 = vpop.f32.mrb[0].mxu0 }
 0x18b   :  { %v1409_v18 = vadd.f32 %v839_v17, %v717_v15  ;;  %v841_v19 = vpop.f32.mrb[1].mxu0 }
 0x18c   :  { %v1411_v20 = vadd.f32 %v841_v19, %v719_v16  ;;  %v843_v21 = vpop.f32.mrb[2].mxu0 }
 0x18d   :  { %v846_v22 = vmax.f32 %v1409_v18, 0.0  ;;  %v844_v23 = vpop.f32.mrb[3].mxu0 }
 0x18e   :  { %v847_v24 = vmax.f32 %v1411_v20, 0.0 }
 0x18f   :  { %v848_v27 = vpack.c.bf16 %v846_v22, %v846_v22 }
 0x190   :  { %v849_v25 = vpack.c.bf16 %v847_v24, %v847_v24 }
 0x192   :  { %1017 = vmatprep.mubr.bf16.mxu1 %v849_v25 }
 0x193   :  { %1018 = vmatmul.mubr.bf16.vlgmr.msra.gmra.mrb[4].mxu1 %v848_v27 }
 0x194   :  { %1383 = vmatpush3.bf16.msra.mxu1 %v1594_v26  ;;  %1398 = vmatprep.mubr.msk.bf16.mxu1 %vm1686_vm1, %v1685_v6 }
 0x195   :  { %1384 = vmatprep.subr.bf16.mxu1 %v1685_v6 }
 0x198   :  { %1385 = vmatpush3.bf16.msra.mxu1 %v1595_v28 }
 0x199   :  { %1386 = vmatprep.subr.bf16.mxu1 %v1685_v6 }
 0x19c   :  { %1387 = vmatpush3.bf16.msra.mxu1 %v1596_v29 }
 0x19d   :  { %1388 = vmatprep.subr.bf16.mxu1 %v1685_v6 }
 0x1a0   :  { %1389 = vmatpush3.bf16.msra.mxu1 %v1597_v30 }
 0x1a1   :  { %1390 = vmatprep.subr.bf16.mxu1 %v1685_v6 }
 0x1a4   :  { %1391 = vmatpush3.bf16.msra.mxu1 %v1598_v31 }
 0x1a5   :  { %1392 = vmatprep.subr.bf16.mxu1 %v1685_v6 }
 0x1a8   :  { %1393 = vmatpush3.bf16.msra.mxu1 %v1599_v32 }
 0x1a9   :  { %1394 = vmatprep.subr.bf16.mxu1 %v1685_v6 }
 0x1ac   :  { %1395 = vmatpush3.bf16.msra.mxu1 %v1600_v33 }
 0x1ad   :  { %1396 = vmatprep.subr.bf16.mxu1 %v1685_v6 }
 0x1b0   :  { %1397 = vmatpush3.bf16.msra.mxu1 %v1601_v34 }
 0x1b1   :  { %1402 = vmatprep.subr.bf16.mxu1 %v1685_v6 }
 0x266   :  { %v1365_v35 = vpop.f32.mrb[4].mxu1 }
 0x267   :  { %v1366_v37 = vpop.f32.mrb[5].mxu1 }
 0x268   :  { %v1367_v38 = vadd.f32 %v1366_v37, %v1365_v35  ;;  %v1368_v39 = vpop.f32.mrb[6].mxu1 }
 0x269   :  { %v1369_v40 = vpop.f32.mrb[7].mxu1 }
 0x26a   :  { %v1020_v41 = vadd.f32 %v1367_v38, %v1321_v36 }
 0x26c   :  { %v1025_v42 = vmax.f32 %v1020_v41, 0.0 }
 0x26e   :  { %v1026_v43 = vpack.c.bf16 %v1025_v42, %v1025_v42 }
 0x270   :  { %1399 = vmatmul.mubr.bf16.vlgmr.msra.gmra.mrb[8].mxu1 %v1026_v43 }
 0x271   :  { %1404 = vmatprep.mubr.msk.bf16.mxu1 %vm1686_vm1, %v1685_v6 }
 0x343   :  { %v1132_v46 = vpop.f32.mrb[8].mxu1 }
 0x344   :  { %v1133_v47 = vadd.f32 %v1338_v45, %v1132_v46  ;;  %v1400_v48 = vpop.f32.mrb[9].mxu1 }
 0x345   :  { %v1135_v49 = vpop.f32.mrb[10].mxu1 }
 0x346   :  { %v1138_v50 = vmax.f32 %v1133_v47, 0.0  ;;  %v1401_v51 = vpop.f32.mrb[11].mxu1 }
 0x348   :  { %v1139_v52 = vpack.c.bf16 %v1138_v50, %v1138_v50 }
 0x34a   :  { %v1156_v53 = vsel %vm1151_vm2, %v1139_v52, 0 }
 0x34b   :  { %1403 = vmatpush3.bf16.xpose.msra.mxu1 %v1156_v53 }
 0x352   :  { %1405 = vmatmul.mubr.msk.bf16.vlgmr.msra.gmra.mrb[12].mxu1 %vm1151_vm2, %v1140_v54 }
 0x425   :  { %v1192_v57 = vpop.f32.mrb[12].mxu1 }
 0x426   :  { %v1193_v58 = vadd.f32 %v1192_v57, %v1150_v56  ;;  %v1406_v59 = vpop.f32.mrb[13].mxu1 }
 0x427   :  { %v1195_v60 = vpop.f32.mrb[14].mxu1 }
 0x428   :  { %v1348_v61 = vmul.f32 -1.442695, %v1193_v58  ;;  %v1407_v62 = vpop.f32.mrb[15].mxu1 }
 0x42a   :  { %1602 = vpow2.f32 %v1348_v61 }
 0x434   :  { %v1603_v63 = vpop.eup %1602 }
 0x435   :  { %v1201_v0 = vadd.f32 1.0, %v1603_v63 }
 0x437   :  { %1604 = vrcp.f32 %v1201_v0 }
 0x441   :  { %v1605_v1 = vpop.eup %1604 }
 0x442   :  { %1205 = vst.msk [vmem:[#allocation8] sm:$0x1] %vm1204_vm3, %v1605_v1 }
 0x443   :  { %1661 = shalt.err (!%p1658_p6)
}
 0x444   :  { %s1662_s0 = scalar_lea.hbm %s1864_s9, 16 }
 0x445   :  { %p1663_p7 = scmp.ne.s32.totalorder %s1864_s9, %s1662_s0  ;;  %p1666_p8 = scmp.lt.u32.totalorder %s1662_s0, %s1864_s9 }
 0x447   :  { %p1668_p9 = pnand %p1666_p8, %p1663_p7 }
 0x449   :  { %1671 = shalt.err (!%p1668_p9)
}
 0x44a   :  { %1215 = dma.vmem_to_hbm [thread:$0]  %s1213_s24, 16, %s1864_s9, [#allocation5]  }
 0x44b   :  { %1676 = dma.done.wait [#allocation5], 16  }
 0x44c   :  { %1677 = vsyncadd [#allocation5], 4294967280 }
 0x44d   :  { %1219 = vsyncpa [#allocation4], 1 }
 0x44e   :  { %1220 = vsyncpa [#allocation7], 1 }
 0x44f   :  { %1221 = vsyncpa [#allocation5], 1 }

</bundles_post_ra>
